<compile_context>
chip_gen: v5e
topology: v5e:2x2
jax: 0.10.0
libtpu: 0.0.40
codegen_flags: <defaults>
</compile_context>

<pallas_src>
import functools

import jax
import jax.numpy as jnp
from jax import lax
from jax.experimental import pallas as pl
from jax.experimental.pallas import tpu as pltpu


# ----------------------------------------------------------------------------
# Generation-aware VMEM budgeting & tile helpers
# ----------------------------------------------------------------------------
def _round_up(x, m):
    return ((x + m - 1) // m) * m


def _tpu_vmem_capacity_bytes():
    try:
        return int(pltpu.get_tpu_info().vmem_capacity_bytes)
    except Exception:
        return 64 * 2**20          # conservative fallback (v7x per-TensorCore)


def _vmem_limit_bytes(est_bytes):
    """Scoped-VMEM request: generous headroom over the estimate, capped at
    ~80% of physical VMEM (leave room for compiler scratch / semaphores).
    Returns None (compiler default) for small kernels so we never inflate
    or under-provision the scoped VMEM of tiny launches."""
    cap = _tpu_vmem_capacity_bytes()
    hi = int(cap * 0.8)
    req = int(est_bytes * 1.5)
    if req <= 32 * 2**20:
        return None
    return min(req, hi)


def _pick_tm(M, target):
    """M-axis tile: a multiple of 8 (or the full dim).  Grids use pl.cdiv with
    a partial last block, so non-power-of-two sequence lengths (e.g. 197)
    keep large tiles.  When M fits in one tile we still split in two so both
    v7x TensorCores get work and input DMA overlaps compute."""
    if M <= 16:
        return M                      # full-dim block (always legal)
    if M <= target:
        half = _round_up(pl.cdiv(M, 2), 8)
        return half if half < M else M
    return target


# ----------------------------------------------------------------------------
# Linear kernels:  out = x @ W (+ b), weight fully VMEM-resident, 1-D grid
# over M (no reduction axis, no accumulator scratch).
# ----------------------------------------------------------------------------
def _linear_kernel(x_ref, w_ref, o_ref, *, mxu_dtype):
    x, w = x_ref[...], w_ref[...]
    if mxu_dtype is not None:          # optional bf16 MXU operands (v6e/v7x)
        x, w = x.astype(mxu_dtype), w.astype(mxu_dtype)
    o_ref[...] = jnp.dot(x, w, preferred_element_type=jnp.float32
                         ).astype(o_ref.dtype)


def _linear_bias_kernel(x_ref, w_ref, b_ref, o_ref, *, mxu_dtype):
    x, w = x_ref[...], w_ref[...]
    if mxu_dtype is not None:
        x, w = x.astype(mxu_dtype), w.astype(mxu_dtype)
    acc = jnp.dot(x, w, preferred_element_type=jnp.float32)
    o_ref[...] = (acc + b_ref[...].astype(jnp.float32)).astype(o_ref.dtype)


def pallas_linear(x2d, w, b=None, *, tm_target=512, mxu_dtype=None):
    """x2d: (M, Cin), w: (Cin, Cout), b: None or (1, Cout) -> (M, Cout)."""
    M, Cin = x2d.shape
    Cin2, Cout = w.shape
    assert Cin == Cin2

    tm = _pick_tm(M, tm_target)
    grid_m = pl.cdiv(M, tm)            # partial last M block: stores masked

    isz = x2d.dtype.itemsize
    est = (2 * tm * Cin * isz          # double-buffered x tile
           + 2 * Cin * Cout * isz      # resident weight (worst-case 2 bufs)
           + 2 * tm * Cout * isz       # double-buffered output tile
           + tm * Cout * 4             # f32 matmul result before the cast
           + 2 * Cout * isz)           # bias
    vmem_limit = _vmem_limit_bytes(est)

    x_spec = pl.BlockSpec((tm, Cin), lambda i: (i, 0))
    w_spec = pl.BlockSpec((Cin, Cout), lambda i: (0, 0))    # stays resident
    o_spec = pl.BlockSpec((tm, Cout), lambda i: (i, 0))     # lane-dense store

    if b is None:
        kernel = functools.partial(_linear_kernel, mxu_dtype=mxu_dtype)
        in_specs, args = [x_spec, w_spec], (x2d, w)
    else:
        kernel = functools.partial(_linear_bias_kernel, mxu_dtype=mxu_dtype)
        b_spec = pl.BlockSpec((1, Cout), lambda i: (0, 0))
        in_specs, args = [x_spec, w_spec, b_spec], (x2d, w, b)

    return pl.pallas_call(
        kernel,
        out_shape=jax.ShapeDtypeStruct((M, Cout), x2d.dtype),
        grid_spec=pltpu.PrefetchScalarGridSpec(
            num_scalar_prefetch=0,
            grid=(grid_m,),
            in_specs=in_specs,
            out_specs=o_spec),
        compiler_params=pltpu.CompilerParams(
            dimension_semantics=("parallel",),
            vmem_limit_bytes=vmem_limit),
    )(*args)


# ----------------------------------------------------------------------------
# Attention kernel: per (batch, Nx-tile) block, all heads processed in-kernel,
# consuming the fused (B, Ny, 2C) k|v projection directly.
# ----------------------------------------------------------------------------
def _attention_kernel(q_ref, kv_ref, o_ref, *, num_heads, mxu_dtype,
                      approx_recip):
    """q arrives pre-scaled (softmax scale folded into Wq).  Head slices are
    lane-offset extracts of the resident (tq, C) / (Ny, 2C) tiles; the H
    per-head matmuls are independent so the scheduler pipelines them on the
    MXU.  Each head's PV output is cast to the output dtype before the lane
    concatenate, and the store is a single lane-dense write of width C."""
    C = q_ref.shape[-1]
    hd = C // num_heads

    q = q_ref[0]                        # (tq, C)
    kv = kv_ref[0]                      # (Ny, 2C) -- fused k|v projection
    k = kv[:, :C]                       # 128-aligned lane offset when C%128==0
    v = kv[:, C:]

    outs = []
    for h in range(num_heads):          # unrolled at trace time
        lo, hi = h * hd, (h + 1) * hd
        qh, kh, vh = q[:, lo:hi], k[:, lo:hi], v[:, lo:hi]
        if mxu_dtype is not None:
            qh, kh = qh.astype(mxu_dtype), kh.astype(mxu_dtype)

        # scores = qh @ kh^T without materializing a transposed copy
        s = lax.dot_general(qh, kh, (((1,), (1,)), ((), ())),
                            preferred_element_type=jnp.float32)   # (tq, Ny)

        # numerically-stable softmax, normalization deferred to the PV output
        m = jnp.max(s, axis=-1, keepdims=True)
        e = jnp.exp(s - m)
        denom = jnp.sum(e, axis=-1, keepdims=True)                 # (tq, 1)

        # attn_drop is identity (p = 0.0)
        pv_dt = mxu_dtype if mxu_dtype is not None else vh.dtype
        pv = jnp.dot(e.astype(pv_dt), vh.astype(pv_dt),
                     preferred_element_type=jnp.float32)           # (tq, hd)
        if approx_recip:
            inv = pl.reciprocal(denom, approx=True)                # EUP slot
        else:
            inv = 1.0 / denom
        outs.append((pv * inv).astype(o_ref.dtype))                # narrow early

    # single lane-dense store of the full C width
    o_ref[0] = jnp.concatenate(outs, axis=-1)


def _attn_vmem_est(tq, Ny, C, itemsize, kv_bufs):
    return ((2 * tq * C + 2 * tq * C) * itemsize   # q + out, double-buffered
            + kv_bufs * Ny * 2 * C * itemsize      # fused k|v tile
            + 4 * tq * Ny * 4                      # f32 score/exp temporaries
            + 3 * tq * C * 4)                      # f32 pv / relayout temps


def pallas_mha_fused(q, kv, num_heads, *, tq_target=256, mxu_dtype=None,
                     approx_recip=True):
    """q: (B, Nx, C), kv: (B, Ny, 2C) fused [k|v] -> (B, Nx, C)."""
    B, Nx, C = q.shape
    _, Ny, twoC = kv.shape
    assert twoC == 2 * C

    cap = _tpu_vmem_capacity_bytes()
    budget = int(cap * 0.5)            # generation-aware working-set budget
    isz = q.dtype.itemsize

    tq = Nx if Nx <= tq_target else tq_target
    kv_bufs = 2
    # Shrink the working set on VMEM-tight parts (v7x: 64 MiB/TC): first give
    # up k/v double-buffering (its block index only changes with b), then tq.
    while _attn_vmem_est(tq, Ny, C, isz, kv_bufs) > budget:
        if kv_bufs == 2:
            kv_bufs = 1
        elif tq > 64:
            tq = max(64, _round_up(tq // 2, 8))
        else:
            # TODO(synk): for very long Ny the (tq, Ny) score tile + full-Ny
            # K/V residency exceed VMEM; switch to a flash-style online
            # softmax tiled over Ny.
            break

    nq = pl.cdiv(Nx, tq)
    if B * nq < 2 and Nx > 16:         # keep both v7x TensorCores busy
        tq = _round_up(pl.cdiv(Nx, 2), 8)
        nq = pl.cdiv(Nx, tq)

    vmem_limit = _vmem_limit_bytes(_attn_vmem_est(tq, Ny, C, isz, kv_bufs))

    kv_spec_kwargs = {}
    if kv_bufs == 1:
        kv_spec_kwargs["pipeline_mode"] = pl.Buffered(1)
    kv_spec = pl.BlockSpec((1, Ny, twoC), lambda b, i: (b, 0, 0),
                           **kv_spec_kwargs)

    kern = functools.partial(_attention_kernel, num_heads=num_heads,
                             mxu_dtype=mxu_dtype, approx_recip=approx_recip)
    return pl.pallas_call(
        kern,
        out_shape=jax.ShapeDtypeStruct((B, Nx, C), q.dtype),
        grid_spec=pltpu.PrefetchScalarGridSpec(
            num_scalar_prefetch=0,
            grid=(B, nq),
            in_specs=[
                pl.BlockSpec((1, tq, C), lambda b, i: (b, i, 0)),
                kv_spec,
            ],
            out_specs=pl.BlockSpec((1, tq, C), lambda b, i: (b, i, 0))),
        compiler_params=pltpu.CompilerParams(
            dimension_semantics=("parallel", "parallel"),
            vmem_limit_bytes=vmem_limit),
    )(q, kv)


# ----------------------------------------------------------------------------
# CrossAttention forward (glue in plain JAX, hot paths in Pallas)
# ----------------------------------------------------------------------------
def prepare_cross_attention_params(raw_params, num_heads):
    """One-time parameter prep, hoisted out of the per-call forward:
      * softmax scale folded into the q projection weight,
      * k and v projection weights fused into a single (C, 2C) matrix."""
    C = raw_params["wq"].shape[0]
    scale = (C // num_heads) ** (-0.5)
    return {
        "wq_scaled": raw_params["wq"] * scale,
        "wkv": jnp.concatenate([raw_params["wk"], raw_params["wv"]], axis=1),
        "wproj": raw_params["wproj"],
        "bproj": raw_params["bproj"],
    }


def cross_attention_forward(params, x, y, num_heads, *, mxu_dtype=None,
                            approx_recip=True):
    """params must come from prepare_cross_attention_params."""
    B, Nx, C = x.shape
    _, Ny, _ = y.shape

    # q projection (qkv_bias=False -> no bias DMA); softmax scale folded in.
    q = pallas_linear(x.reshape(B * Nx, C), params["wq_scaled"],
                      mxu_dtype=mxu_dtype).reshape(B, Nx, C)

    # fused k/v projection: y is read from HBM once, W = [Wk | Wv]; the fused
    # (B, Ny, 2C) result feeds the attention kernel directly (no wrapper-level
    # k/v slices -> no extra HBM copies between the two pallas_calls).
    kv = pallas_linear(y.reshape(B * Ny, C), params["wkv"],
                       mxu_dtype=mxu_dtype).reshape(B, Ny, 2 * C)

    # TODO(synk): rope is None in this configuration; no rotary embedding.
    o = pallas_mha_fused(q, kv, num_heads, mxu_dtype=mxu_dtype,
                         approx_recip=approx_recip)            # (B, Nx, C)

    out = pallas_linear(o.reshape(B * Nx, C), params["wproj"],
                        params["bproj"], mxu_dtype=mxu_dtype)
    # proj_drop is identity (p = 0.0)
    return out.reshape(B, Nx, C)


# ----------------------------------------------------------------------------
# Pure-JAX reference (for sanity check)
# ----------------------------------------------------------------------------
def reference_forward(raw_params, x, y, num_heads):
    B, Nx, C = x.shape
    _, Ny, _ = y.shape
    hd = C // num_heads
    scale = hd ** (-0.5)
    q = (x @ raw_params["wq"]).reshape(B, Nx, num_heads, hd).transpose(0, 2, 1, 3)
    k = (y @ raw_params["wk"]).reshape(B, Ny, num_heads, hd).transpose(0, 2, 1, 3)
    v = (y @ raw_params["wv"]).reshape(B, Ny, num_heads, hd).transpose(0, 2, 1, 3)
    attn = jnp.einsum("bhqd,bhkd->bhqk", q, k) * scale
    attn = jax.nn.softmax(attn, axis=-1)
    o = jnp.einsum("bhqk,bhkd->bhqd", attn, v)
    o = o.transpose(0, 2, 1, 3).reshape(B, Nx, C)
    return o @ raw_params["wproj"] + raw_params["bproj"][0]


if __name__ == "__main__":
    # Small shapes, chosen to exercise the cdiv/partial-block paths:
    #   M = B*Nx = 40 -> tm = 24, 2 grid steps with a partial last M block.
    B, Nx, Ny, C, H = 2, 20, 24, 64, 8
    dtype = jnp.float32

    key = jax.random.PRNGKey(0)
    kx, ky, k1, k2, k3, k4, k5 = jax.random.split(key, 7)

    x = jax.random.normal(kx, (B, Nx, C), dtype)
    y = jax.random.normal(ky, (B, Ny, C), dtype)

    # Deterministic synthetic weights, stored as (C_in, C_out).
    s = 1.0 / jnp.sqrt(jnp.array(C, dtype))
    raw_params = {
        "wq": jax.random.uniform(k1, (C, C), dtype, -s, s),
        "wk": jax.random.uniform(k2, (C, C), dtype, -s, s),
        "wv": jax.random.uniform(k3, (C, C), dtype, -s, s),
        "wproj": jax.random.uniform(k4, (C, C), dtype, -s, s),
        "bproj": jax.random.uniform(k5, (1, C), dtype, -s, s),
    }
    params = prepare_cross_attention_params(raw_params, H)

    out = cross_attention_forward(params, x, y, H)
    out = jax.block_until_ready(out)

    ref = reference_forward(raw_params, x, y, H)
    assert out.shape == (B, Nx, C)
    # Tolerance accounts for the EUP approximate-reciprocal softmax
    # normalization (pl.reciprocal(approx=True)).
    assert jnp.allclose(out, ref, atol=5e-3, rtol=5e-3), "mismatch vs reference"

    print("KERNEL_OK")
</pallas_src>

<mosaic_0001>
module attributes {stable_mosaic.version = 11 : i64} {
  func.func @_linear_kernel(%arg0: i32, %arg1: memref<24x64xf32, #tpu.memory_space<vmem>>, %arg2: memref<64x64xf32, #tpu.memory_space<vmem>>, %arg3: memref<24x64xf32, #tpu.memory_space<vmem>>) attributes {dimension_semantics = [#tpu.dimension_semantics<parallel>], iteration_bounds = array<i64: 2>, scalar_prefetch = 0 : i64, scratch_operands = 0 : i64, tpu.core_type = #tpu.core_type<tc>, window_params = [{transform_indices = @transform_0, window_bounds = array<i64: 24, 64>}, {pipeline_mode = #tpu.pipeline_mode<synchronous>, transform_indices = @transform_1, window_bounds = array<i64: 64, 64>}, {transform_indices = @transform_2, window_bounds = array<i64: 24, 64>}]} {
    %c0 = arith.constant 0 : index
    %c0_0 = arith.constant 0 : index
    %0 = vector.load %arg1[%c0, %c0_0] : memref<24x64xf32, #tpu.memory_space<vmem>>, vector<24x64xf32>
    %c0_1 = arith.constant 0 : index
    %c0_2 = arith.constant 0 : index
    %1 = vector.load %arg2[%c0_1, %c0_2] : memref<64x64xf32, #tpu.memory_space<vmem>>, vector<64x64xf32>
    %cst = arith.constant dense<0.000000e+00> : vector<24x64xf32>
    %2 = tpu.matmul %0, %1, %cst {dimension_numbers = #tpu.dot_dimension_numbers<[1], [0], [0], [1], [0, 0, 1, 1], [], []>} : vector<24x64xf32>, vector<64x64xf32>, vector<24x64xf32> -> vector<24x64xf32>
    %c0_3 = arith.constant 0 : index
    %c0_4 = arith.constant 0 : index
    %3 = vector.load %arg3[%c0_3, %c0_4] : memref<24x64xf32, #tpu.memory_space<vmem>>, vector<24x64xf32>
    tpu.vector_store %arg3[%c0_3, %c0_4], %2 {strides = array<i32>} : memref<24x64xf32, #tpu.memory_space<vmem>>, vector<24x64xf32>,
    return
  }
  func.func @transform_0(%arg0: i32) -> (i32, i32) {
    %c0_i32 = arith.constant 0 : i32
    %c0_i32_0 = arith.constant 0 : i32
    return %arg0, %c0_i32 : i32, i32
  }
  func.func @transform_1(%arg0: i32) -> (i32, i32) {
    %c0_i32 = arith.constant 0 : i32
    %c0_i32_0 = arith.constant 0 : i32
    %c0_i32_1 = arith.constant 0 : i32
    return %c0_i32, %c0_i32_0 : i32, i32
  }
  func.func @transform_2(%arg0: i32) -> (i32, i32) {
    %c0_i32 = arith.constant 0 : i32
    %c0_i32_0 = arith.constant 0 : i32
    return %arg0, %c0_i32 : i32, i32
  }
}

</mosaic_0001>

<bundles_post_ra>
// kernel: tpu_custom_call.1
= control target key start
LH: loop header
LB: loop body
LE: loop exit
PB: predicated region body
PF: predicated region fallthrough
CT: control target
= control target key end

     0   :  { %7 = vsyncpa [#allocation3], 0  ;;  %s840_s0 = inlined_call_operand.hbm [shape: f32[40,64], index: 0, kind: input, shape index: {}]   ;;  %s841_s1 = inlined_call_operand.hbm [shape: f32[64,64], index: 1, kind: input, shape index: {}]   ;;  %s842_s2 = inlined_call_operand.hbm [shape: f32[40,64], index: 2, kind: output, shape index: {}]  }
   0x1   :  { %9 = vsyncpa [#allocation3 + $0x1], 0 }
   0x2   :  { %10 = vsyncpa [#allocation6], 0 }
   0x3   :  { %11 = vsyncpa [#allocation4], 0 }
   0x4   :  { %13 = vsyncpa [#allocation4 + $0x1], 0  ;;  %s627_s9 = smov 0   ;;  %s629_s10 = smov 0  }
   0x5   :  { %s631_s11 = smov 0   ;;  %s633_s12 = smov 0  }
   0x6 LB: > { %s648_s13 = sadd.s32 4294967295, %s601_s12   ;;  %s354_s14 = sadd.s32 4294967294, %s601_s12   ;;  %s601_s12 = sphi %s633_s12, %s859_s12   ;;  %s597_s11 = sphi %s631_s11, %s858_s11   ;;  %s593_s10 = sphi %s629_s10, %s857_s10   ;;  %s589_s9 = sphi %s627_s9, %s856_s9  }
   0x7   : > { %s652_s15 = sadd.s32 1, %s601_s12   ;;  %s26_s16 = sadd.s32 1, %s597_s11 }
   0x8   : > { %s23_s17 = ssub.s32 %s601_s12, %s652_s15  ;;  %p33_p0 = scmp.ne.s32.totalorder %s597_s11, %s593_s10 }
   0x9   : > { %p24_p1 = scmp.eq.s32.totalorder %s23_s17, 0  ;;  %p34_p2 = scmp.eq.s32.totalorder %s601_s12, 0 }
   0xa   : > { %p39_p3 = scmp.ne.s32.totalorder %s593_s10, %s589_s9  ;;  %p844_p4 = scmp.eq.s32.totalorder %s648_s13, 0 }
   0xb   : > { %s664_s18 = scalar_select %p24_p1, %s597_s11, %s26_s16  }
   0xc   : > { %p666_p5 = por %p34_p2, %p33_p0  ;;  %p672_p6 = por %p844_p4, %p39_p3 }
   0xd   : > { %p84_p7 = scmp.eq.s32.totalorder %s648_s13, 1  ;;  %p90_p8 = scmp.eq.s32.totalorder %s354_s14, 1 }
   0xe   : > { %p355_p9 = scmp.ge.s32.totalorder %s601_s12, 1  ;;  %p97_p10 = scmp.lt.s32.totalorder %s601_s12, 3 }
   0xf   : > { %p679_p11 = por %p84_p7, %p33_p0  ;;  %p683_p12 = por %p90_p8, %p39_p3 }
  0x10   : > { %p687_p13 = pnand %p355_p9, %p97_p10  ;;  %s108_s26 = sshll.u32 %s841_s1, 4  ;;  %s109_s26 = int_to_ptr.hbm [resolvable:$true] %s108_s26 }
  0x11   : > { %s848_s22 = scalar_select %p683_p12, 1, 0 }
  0x12   : > { %p401_p1 = pneg %p687_p13  ;;  %s603_s27 = smov [#allocation5]  }
  0x13   : > { %s110_s28 = sshll.u32 %s603_s27, 4  ;;  %s604_s29 = smov 128   ;;  %s111_s28 = int_to_ptr.vmem [resolvable:$true] %s110_s28 }
  0x14   : > { %p402_p0 = pnand %p401_p1, %p844_p4  ;;  %s605_s30 = smov 8  }
  0x15   : > { %p843_p2 = scmp.ge.s32.totalorder %s601_s12, 2 }
  0x16   : > { %404 = dma.hbm_to_vmem [thread:$0]  (!%p402_p0), %s109_s26, 1024, %s111_s28, [#allocation6], %s604_s29, %s604_s29, %s605_s30  }
  0x17   : > { %120 = sbr.rel (%p843_p2) target bundleno = 66 (0x42), region = 20 }
  0x1c   : > { %123 = sbr.rel (!%p666_p5) target bundleno = 66 (0x42), region = 24  ;;  %s124_s3 = sand.u32 (%p666_p5), 1, %s597_s11  }
  0x1d   : > { %s129_s4 = smul.u32 (%p666_p5), 3, %s601_s12  ;;  %s708_s16 = scalar_lea.sflag (%p666_p5), [#allocation3], %s124_s3 }
  0x1e   : > { %s393_s5 = smul.u32 (%p666_p5), 24, %s124_s3 }
  0x1f   : > { %s130_s6 = ssub.s32 (%p666_p5), 5, %s129_s4 }
  0x20   : > { %p131_p3 = scmp.lt.s32.totalorder (%p666_p5), %s130_s6, 3  ;;  %s128_s17 = scalar_lea.vmem (%p666_p5), [#allocation2], %s393_s5 }
  0x22   : > { %s861_s6 = smov (!%p131_p3, %s130_s6), 3 }
  0x23   : > { %s358_s7 = sshll.u32 %s861_s6, 3 }
  0x24   : > { %s134_s8 = ssub.s32 24, %s358_s7 }
  0x25   : > { %s135_s14 = sshll.u32 %s134_s8, 4 }
  0x26   : > { %136 = vsyncadd %s708_s16, %s135_s14  ;;  %p711_p5 = scmp.ne.s32.totalorder %s358_s7, 0  ;;  %s375_s24 = smul.u32 24, %s601_s12 }
  0x27   : > { %s716_s25 = sshll.u32 %s128_s17, 4  ;;  %s362_s26 = sshll.u32 %s861_s6, 7  ;;  %s144_s25 = int_to_ptr.vmem [resolvable:$true] %s716_s25 }
  0x28   : > { %s139_s29 = scalar_lea.hbm %s840_s0, %s375_s24  ;;  %s483_s4 = sshrl.u32 %s362_s26, 4 }
  0x29   : > { %s141_s30 = sshll.u32 %s139_s29, 4  ;;  %s492_s14 = scalar_lea.hbm %s840_s0, 40  ;;  %s723_s30 = int_to_ptr.hbm [resolvable:$true] %s141_s30 }
  0x2a   : > { %s481_s3 = sshra.s32 %s723_s30, 4  ;;  %s482_s3 = int_to_ptr.hbm [resolvable:$true] %s481_s3 }
  0x2b   : > { %s488_s5 = scalar_lea.hbm %s482_s3, %s483_s4  ;;  %p493_p10 = scmp.lt.s32.totalorder %s482_s3, %s840_s0 }
  0x2c   : > { %p489_p7 = scmp.ne.s32.totalorder %s482_s3, %s488_s5  ;;  %p494_p1 = scmp.lt.s32.totalorder %s492_s14, %s488_s5 }
  0x2e   : > { %p490_p8 = pnand %p489_p7, %p711_p5  ;;  %p495_p0 = por %p494_p1, %p493_p10 }
  0x30   : > { %p491_p9 = pneg %p490_p8 }
  0x32   : > { %p496_p3 = pnand %p495_p0, %p491_p9 }
  0x34   : > { %499 = shalt.err (!%p496_p3)
}
  0x35   : > { %s500_s27 = sshra.s32 %s144_s25, 4  ;;  %s606_s29 = smov [#allocation2]   ;;  %s501_s27 = int_to_ptr.vmem [resolvable:$true] %s500_s27 }
  0x36   : > { %s507_s28 = scalar_lea.vmem %s501_s27, %s483_s4  ;;  %s511_s7 = scalar_lea.vmem %s606_s29, 48 }
  0x37   : > { %p508_p7 = scmp.ne.s32.totalorder %s501_s27, %s507_s28  ;;  %p513_p4 = scmp.lt.s32.totalorder %s511_s7, %s507_s28 }
  0x39   : > { %p509_p8 = pnand %p508_p7, %p711_p5 }
  0x3b   : > { %p510_p2 = pneg %p509_p8 }
  0x3d   : > { %p515_p12 = pnand %p513_p4, %p510_p2 }
  0x3f   : > { %518 = shalt.err (!%p515_p12)
}
  0x40   : > { %s607_s3 = smov 128   ;;  %s608_s5 = smov 8  }
  0x41   : > { %149 = dma.hbm_to_vmem [thread:$0]  (%p711_p5), %s723_s30, %s362_s26, %s144_s25, %s708_s16, %s607_s3, %s607_s3, %s608_s5  }
  0x42 PF: > { %155 = sbr.rel (%p687_p13) target bundleno = 255 (0xff), region = 28  ;;  %s751_s4 = sand.u32 (!%p687_p13), 1, %s593_s10  }
  0x43   : > { %s394_s8 = smul.u32 (!%p687_p13), 24, %s751_s4  ;;  %s158_s14 = scalar_lea.sflag (!%p687_p13), [#allocation3], %s751_s4 }
  0x45   : > { %s757_s17 = scalar_lea.vmem (!%p687_p13), [#allocation2], %s394_s8 }
  0x47   : > { %576 = dma.done.wait (%p672_p6), %s158_s14, 384  }
  0x48   : > { %578 = vsyncadd (%p672_p6), %s158_s14, 4294966912  ;;  %p851_p4 = scmp.eq.s32.totalorder %s648_s13, 0 }
  0x4a   : > { %580 = dma.done.wait (%p851_p4), [#allocation6], 1024   ;;  %p852_p12 = pmov %p851_p4 }
  0x4b   : > { %v208_v0 = vld [vmem:[#allocation5 + $0x38] sm:$0xff]  ;;  %v207_v1 = vld [vmem:[#allocation5 + $0x30] sm:$0xff]  ;;  %v206_v2 = vld [vmem:[#allocation5 + $0x28] sm:$0xff]  ;;  %vm209_vm0 = vcmask 523264   ;;  %s187_s20 = scalar_lea.vmem [#allocation7], %s394_s8  ;;  %s249_s23 = scalar_lea.sflag [#allocation4], %s751_s4 }
  0x4c   : > { %582 = vsyncadd (%p852_p12), [#allocation6], 4294966272  ;;  %378 = vmatpush.msra.mxu2 %v208_v0  ;;  %227 = vmatpush.msra.mxu0 %v208_v0  ;;  %v205_v3 = vld [vmem:[#allocation5 + $0x20] sm:$0xff]  ;;  %v204_v4 = vld [vmem:[#allocation5 + $0x18] sm:$0xff]  ;;  %s256_s6 = smul.u32 (%p679_p11), 3, %s648_s13 }
  0x4d   : > { %377 = vmatpush.msra.mxu1 %v208_v0  ;;  %v203_v5 = vld [vmem:[#allocation5 + $0x10] sm:$0xff]  ;;  %v202_v6 = vld [vmem:[#allocation5 + $0x8] sm:$0xff]  ;;  %v201_v7 = vld [vmem:[#allocation5] sm:$0xff] }
  0x4e   : > { %380 = vmatpush.msra.mxu2 %v207_v1  ;;  %228 = vmatpush.msra.mxu0 %v207_v1  ;;  %v200_v8 = vld [vmem:[%s757_s17 + $0x10] sm:$0xff]  ;;  %v198_v9 = vld [vmem:[%s757_s17] sm:$0xff]  ;;  %v199_v10 = vld [vmem:[%s757_s17 + $0x8] sm:$0xff]  ;;  %s257_s16 = ssub.s32 (%p679_p11), 5, %s256_s6 }
  0x4f   : > { %379 = vmatpush.msra.mxu1 %v207_v1  ;;  %p258_p6 = scmp.lt.s32.totalorder (%p679_p11), %s257_s16, 3 }
  0x50   : > { %382 = vmatpush.msra.mxu2 %v206_v2  ;;  %229 = vmatpush.msra.mxu0 %v206_v2 }
  0x51   : > { %381 = vmatpush.msra.mxu1 %v206_v2 }
  0x52   : > { %384 = vmatpush.msra.mxu2 %v205_v3  ;;  %230 = vmatpush.msra.mxu0 %v205_v3 }
  0x53   : > { %383 = vmatpush.msra.mxu1 %v205_v3 }
  0x54   : > { %386 = vmatpush.msra.mxu2 %v204_v4  ;;  %231 = vmatpush.msra.mxu0 %v204_v4 }
  0x55   : > { %385 = vmatpush.msra.mxu1 %v204_v4 }
  0x56   : > { %388 = vmatpush.msra.mxu2 %v203_v5  ;;  %232 = vmatpush.msra.mxu0 %v203_v5 }
  0x57   : > { %387 = vmatpush.msra.mxu1 %v203_v5 }
  0x58   : > { %390 = vmatpush.msra.mxu2 %v202_v6  ;;  %233 = vmatpush.msra.mxu0 %v202_v6 }
  0x59   : > { %389 = vmatpush.msra.mxu1 %v202_v6 }
  0x5a   : > { %392 = vmatpush.msra.mxu2 %v201_v7  ;;  %234 = vmatpush.msra.mxu0 %v201_v7 }
  0x5b   : > { %367 = vmatmul.msk.f32.vlgmr.msra.gmra.mxu2 %vm209_vm0, %v200_v8  ;;  %391 = vmatpush.msra.mxu1 %v201_v7 }
  0x5c   : > { %365 = vmatmul.msk.f32.vlgmr.msra.gmra.mxu0 %vm209_vm0, %v198_v9  ;;  %366 = vmatmul.msk.f32.vlgmr.msra.gmra.mxu1 %vm209_vm0, %v199_v10 }
  0xd9   : > { %v236_v11 = vpop.f32.mrf.mxu0  ;;  %v239_v12 = vpop.f32.mrf.mxu1 }
  0xda   : > { %245 = vst.msk [vmem:[%s187_s20] sm:$0xff] %vm209_vm0, %v236_v11 }
  0xdb   : > { %246 = vst.msk [vmem:[%s187_s20 + $0x8] sm:$0xff] %vm209_vm0, %v239_v12  ;;  %255 = sbr.rel (!%p679_p11) target bundleno = 255 (0xff), region = 40 }
  0xde   : > { %v242_v13 = vpop.f32.mrf.mxu2 }
  0xdf   : > { %247 = vst.msk [vmem:[%s187_s20 + $0x10] sm:$0xff] %vm209_vm0, %v242_v13 }
  0xe0   : > { %s863_s16 = smov (!%p258_p6, %s257_s16), 3 }
  0xe1   : > { %s368_s19 = sshll.u32 %s863_s16, 3 }
  0xe2   : > { %s261_s25 = ssub.s32 24, %s368_s19 }
  0xe3   : > { %s262_s26 = sshll.u32 %s261_s25, 4 }
  0xe4   : > { %263 = vsyncadd %s249_s23, %s262_s26  ;;  %p787_p13 = scmp.ne.s32.totalorder %s368_s19, 0  ;;  %s376_s21 = smul.u32 24, %s648_s13 }
  0xe5   : > { %s268_s24 = sshll.u32 %s187_s20, 4  ;;  %s372_s27 = sshll.u32 %s863_s16, 7  ;;  %s796_s24 = int_to_ptr.vmem [resolvable:$true] %s268_s24 }
  0xe6   : > { %s266_s7 = scalar_lea.hbm %s842_s2, %s376_s21  ;;  %s520_s5 = sshra.s32 %s796_s24, 4  ;;  %s521_s5 = int_to_ptr.vmem [resolvable:$true] %s520_s5 }
  0xe7   : > { %s270_s3 = sshll.u32 %s266_s7, 4  ;;  %s522_s8 = sshrl.u32 %s372_s27, 4  ;;  %s798_s3 = int_to_ptr.hbm [resolvable:$true] %s270_s3 }
  0xe8   : > { %s527_s14 = scalar_lea.vmem %s521_s5, %s522_s8  ;;  %s609_s13 = smov [#allocation7]  }
  0xe9   : > { %p528_p11 = scmp.ne.s32.totalorder %s521_s5, %s527_s14  ;;  %s531_s17 = scalar_lea.vmem %s609_s13, 48 }
  0xea   : > { %p533_p9 = scmp.lt.s32.totalorder %s531_s17, %s527_s14 }
  0xeb   : > { %p529_p2 = pnand %p528_p11, %p787_p13 }
  0xed   : > { %p530_p5 = pneg %p529_p2 }
  0xef   : > { %p535_p10 = pnand %p533_p9, %p530_p5 }
  0xf1   : > { %538 = shalt.err (!%p535_p10)
}
  0xf2   : > { %s539_s20 = sshra.s32 %s798_s3, 4  ;;  %s550_s26 = scalar_lea.hbm %s842_s2, 40  ;;  %s540_s20 = int_to_ptr.hbm [resolvable:$true] %s539_s20 }
  0xf3   : > { %s546_s6 = scalar_lea.hbm %s540_s20, %s522_s8  ;;  %p551_p7 = scmp.lt.s32.totalorder %s540_s20, %s842_s2 }
  0xf4   : > { %p547_p1 = scmp.ne.s32.totalorder %s540_s20, %s546_s6  ;;  %p552_p8 = scmp.lt.s32.totalorder %s550_s26, %s546_s6 }
  0xf6   : > { %p548_p0 = pnand %p547_p1, %p787_p13  ;;  %p553_p4 = por %p552_p8, %p551_p7 }
  0xf8   : > { %p549_p3 = pneg %p548_p0 }
  0xfa   : > { %p554_p12 = pnand %p553_p4, %p549_p3 }
  0xfc   : > { %557 = shalt.err (!%p554_p12)
}
  0xfd   : > { %s610_s29 = smov 128   ;;  %s611_s7 = smov 8  }
  0xfe   : > { %276 = dma.vmem_to_hbm [thread:$0]  (%p787_p13), %s796_s24, %s372_s27, %s798_s3, %s249_s23, %s610_s29, %s610_s29, %s611_s7  }
  0xff PF: > { %s285_s5 = sand.u32 1, %s589_s9   ;;  %p854_p6 = scmp.ne.s32.totalorder %s848_s22, 0 }
 0x100   : > { %p855_p11 = scmp.ge.s32.totalorder %s601_s12, 2  ;;  %s286_s8 = scalar_lea.sflag [#allocation4], %s285_s5 }
 0x102   : > { %p406_p2 = pnand %p855_p11, %p854_p6 }
 0x104   : > { %p407_p5 = pneg %p406_p2 }
 0x106   : > { %584 = dma.done.wait (%p407_p5), %s286_s8, 384  }
 0x107   : > { %586 = vsyncadd (%p407_p5), %s286_s8, 4294966912  ;;  %p16_p9 = scmp.ge.s32.totalorder %s652_s15, 4   ;;  %s856_s9 = smov %s593_s10 }
 0x108   : > { %s857_s10 = smov %s597_s11  ;;  %s858_s11 = smov %s664_s18 }
 0x109   : > { %s859_s12 = smov %s652_s15  ;;  %18 = sbr.rel (!%p16_p9) target bundleno = 6 (0x6), region = 77 }
 0x10e   :  { %292 = vsyncpa [#allocation3], 1 }
 0x10f   :  { %294 = vsyncpa [#allocation3 + $0x1], 1 }
 0x110   :  { %295 = vsyncpa [#allocation6], 1 }
 0x111   :  { %296 = vsyncpa [#allocation4], 1 }
 0x112   :  { %298 = vsyncpa [#allocation4 + $0x1], 1 }

</bundles_post_ra>
